<compile_context>
chip_gen: v6e
topology: v6e:2x2x1
jax: 0.10.0
libtpu: 0.0.40
codegen_flags: <defaults>
</compile_context>

<pallas_src>
import functools

import numpy as np
import jax
import jax.numpy as jnp
from jax.experimental import pallas as pl
from jax.experimental.pallas import tpu as pltpu

KSIZE = 5
PAD = KSIZE // 2  # 'same' padding for stride 1
LANE = 128


# ---------------------------------------------------------------------------
# In-kernel helpers
# ---------------------------------------------------------------------------
def _group_reduce_bcast(v, group, *, is_max):
    """Per contiguous group of `group` sublane rows of v (n, 1): reduce
    (max or sum) and broadcast the result back to every row of its group.

    Uses only full reductions, sublane rolls, iota masks and elementwise ops
    (no reshapes / transposes), so it lowers cleanly for any (n, group)."""
    n = v.shape[0]
    if group == 1:
        return v
    if group == n:  # single image in the block -> plain full reduction
        r = jnp.max(v, keepdims=True) if is_max else jnp.sum(v, keepdims=True)
        return jnp.broadcast_to(r, v.shape)

    op = jnp.maximum if is_max else jnp.add
    pow2 = (group & (group - 1)) == 0

    # 1) width-`group` sliding-window reduce (value correct at group-start rows).
    t = v
    if pow2:
        width = 1
        while width < group:
            t = op(t, pltpu.roll(t, shift=(-width) % n, axis=0))
            width *= 2
    else:
        for k in range(1, group):
            t = op(t, pltpu.roll(v, shift=(-k) % n, axis=0))

    # 2) keep group-start rows only, then scatter that value down the group.
    row = jax.lax.broadcasted_iota(jnp.int32, (n, 1), 0)
    s = jnp.where(row % group == 0, t, jnp.zeros_like(t))
    if pow2:
        width = 1
        while width < group:
            s = s + pltpu.roll(s, shift=width, axis=0)
            width *= 2
    else:
        s0 = s
        for k in range(1, group):
            s = s + pltpu.roll(s0, shift=k, axis=0)
    return s


def _pca_kernel(x_ref, tw_ref, b_ref, o_ref, *, C, W, inv_hw):
    # x_ref : (Bt*C, HWp)      input rows (image-major, channel-fastest), H*W on lanes
    # tw_ref: (25, Bt*C, HWp)  fused (tap weight x boundary mask), VMEM resident
    # b_ref : (Bt*C, 1)        depthwise-conv bias tiled over the block's images
    # o_ref : (Bt*C, HWp)
    hwp = x_ref.shape[-1]

    x = x_ref[...].astype(jnp.float32)
    bias = b_ref[...]

    # per-(image, channel) mean of the input (pad lanes are zero; true-HW divisor)
    c = jnp.sum(x, axis=-1, keepdims=True) * inv_hw                 # (n, 1)

    # Depthwise 5x5 'same' conv (cross-correlation, as nn.Conv2d): each tap is
    # one lane roll (XLU) of the already-loaded block times a precomputed
    # weight*mask slab (VPU).  One partial accumulator per kernel row for ILP.
    # TODO(synk): if bundle dumps show the 2 XLU slots binding on v6e/v7x,
    # stage x in a zero-row-padded VMEM scratch and read row-shifted pl.ds
    # slices instead of lane rolls.
    partial = []
    for kh in range(KSIZE):
        acc = None
        for kw in range(KSIZE):
            k = kh * KSIZE + kw
            s = (kh - PAD) * W + (kw - PAD)                          # flat shift
            rolled = x if s == 0 else pltpu.roll(x, shift=(-s) % hwp, axis=1)
            term = rolled * tw_ref[k]
            acc = term if acc is None else acc + term
        partial.append(acc)
    y0 = ((partial[0] + partial[1]) + (partial[2] + partial[3])) + partial[4]

    # per-(image, channel) mean of the conv output; pad lanes of y0 are exact
    # zeros (masked taps), so mean(y) = sum(conv)/HW + bias.
    c_ = jnp.sum(y0, axis=-1, keepdims=True) * inv_hw + bias         # (n, 1)

    # softmax over the C channels of each image (a group = C consecutive rows)
    d = c_ - c
    dmax = _group_reduce_bcast(d, C, is_max=True)
    e = jnp.exp(d - dmax)
    esum = _group_reduce_bcast(e, C, is_max=False)
    inv = pl.reciprocal(esum, approx=True)
    inv = inv * (2.0 - esum * inv)        # one Newton step: EUP seed, ~f32 accuracy
    raise_ch = e * inv

    att = jax.nn.sigmoid(c_ + c_ * raise_ch)                         # (n, 1)
    o_ref[...] = ((y0 + bias) * att).astype(o_ref.dtype)


# ---------------------------------------------------------------------------
# Host-side setup
# ---------------------------------------------------------------------------
@functools.lru_cache(maxsize=None)
def _boundary_masks_np(H, W, HWp):
    """(25, HWp) f32 masks: tap (kh, kw) in-bounds at flat output position p;
    zero on the lane-padding region [H*W, HWp)."""
    HW = H * W
    h = np.arange(HW, dtype=np.int64) // W
    w = np.arange(HW, dtype=np.int64) % W
    m = np.zeros((KSIZE * KSIZE, HWp), np.float32)
    for kh in range(KSIZE):
        for kw in range(KSIZE):
            dh, dw = kh - PAD, kw - PAD
            ok = (h + dh >= 0) & (h + dh < H) & (w + dw >= 0) & (w + dw < W)
            m[kh * KSIZE + kw, :HW] = ok.astype(np.float32)
    return m


def _vmem_budget_bytes():
    """Generation-aware budget for the per-step working set (v7x has only
    64 MiB of physical VMEM; v5e/v6e have 128 MiB)."""
    try:
        cap = pltpu.get_tpu_info().vmem_capacity_bytes
    except Exception:
        cap = 64 << 20
    return int(min(24 << 20, cap // 3))


def _working_set_bytes(Bt, C, HWp):
    slab = Bt * C * HWp * 4
    # 2x double-buffered input + 2x output + 2x fused-tap slabs (25 each)
    # + ~8 live f32 temporaries inside the tap loop.
    return (2 + 2 + 2 * 25 + 8) * slab


def _pick_block_batch(B, C, HWp, budget_bytes):
    divisors = [d for d in range(B, 0, -1) if B % d == 0]
    fits = [d for d in divisors if _working_set_bytes(d, C, HWp) <= budget_bytes] or [1]

    def score(bt):
        steps = B // bt
        return (
            steps >= 2,          # pipeline overlap + 2nd TensorCore on v7x
            (bt * C) % 8 == 0,   # full f32 sublane occupancy of every vreg
            bt,                  # then amortize ~0.35us/step grid overhead
        )

    return max(fits, key=score)


def pca_forward(x_nchw, w_dw, b_dw):
    """x_nchw: (B, C, H, W); w_dw: (C, 1, 5, 5); b_dw: (C,). Returns (B, C, H, W)."""
    B, C, H, W = x_nchw.shape
    HW = H * W
    HWp = ((HW + LANE - 1) // LANE) * LANE   # lane-dense last dim (unmasked vst)

    budget = _vmem_budget_bytes()
    Bt = _pick_block_batch(B, C, HWp, budget)
    G = B // Bt
    N = Bt * C
    # TODO(synk): for B == 1 the grid collapses to one step; split H*W into
    # halo'd row-bands on a second parallel axis (two-pass channel means) to
    # occupy both v7x TensorCores and enable pipelining.

    # Free contiguous reshapes; pad the flat spatial axis only if needed.
    x_flat = x_nchw.reshape(B, C, HW)
    if HWp != HW:
        x_flat = jnp.pad(x_flat, ((0, 0), (0, 0), (0, HWp - HW)))
    x_g = x_flat.reshape(G, N, HWp)

    # Fused (tap weight x boundary mask) slabs, tiled over the Bt images of a
    # block so the kernel multiplies them straight against the packed rows.
    # TODO(synk): for large H*W, generate the boundary masks in-kernel from two
    # iota compares (or factor row/col masks) instead of this dense slab.
    masks = jnp.asarray(_boundary_masks_np(H, W, HWp))                    # (25, HWp)
    w_taps = jnp.transpose(w_dw.reshape(C, KSIZE * KSIZE))                # (25, C)
    tw = w_taps[:, :, None].astype(jnp.float32) * masks[:, None, :]       # (25, C, HWp)
    tw = jnp.tile(tw, (1, Bt, 1))                                         # (25, N, HWp)
    bias = jnp.tile(b_dw.astype(jnp.float32), (Bt,)).reshape(N, 1)        # (N, 1)

    ws = _working_set_bytes(Bt, C, HWp)
    vmem_limit = int(min(48 << 20, max(16 << 20, 2 * ws)))  # derived from working set

    kernel = functools.partial(_pca_kernel, C=C, W=W, inv_hw=1.0 / HW)

    out_g = pl.pallas_call(
        kernel,
        out_shape=jax.ShapeDtypeStruct((G, N, HWp), x_nchw.dtype),
        grid=(G,),
        in_specs=[
            pl.BlockSpec((None, N, HWp), lambda g: (g, 0, 0)),
            pl.BlockSpec((KSIZE * KSIZE, N, HWp), lambda g: (0, 0, 0)),  # resident
            pl.BlockSpec((N, 1), lambda g: (0, 0)),                      # resident
        ],
        out_specs=pl.BlockSpec((None, N, HWp), lambda g: (g, 0, 0)),
        compiler_params=pltpu.CompilerParams(
            dimension_semantics=("parallel",),
            vmem_limit_bytes=vmem_limit,
        ),
    )(x_g, tw, bias)

    out = out_g.reshape(B, C, HWp)
    if HWp != HW:
        out = out[:, :, :HW]
    return out.reshape(B, C, H, W)


# ---------------------------------------------------------------------------
# Pure-JAX reference of the PyTorch forward (NCHW)
# ---------------------------------------------------------------------------
def pca_reference(x, w, b):
    B, C, H, W = x.shape
    c = jnp.mean(x, axis=(2, 3))
    y = jax.lax.conv_general_dilated(
        x, w, window_strides=(1, 1), padding="SAME",
        feature_group_count=C,
        dimension_numbers=("NCHW", "OIHW", "NCHW"),
    ) + b[None, :, None, None]
    c_ = jnp.mean(y, axis=(2, 3))
    raise_ch = jax.nn.softmax(c_ - c, axis=1)
    att = jax.nn.sigmoid(c_ + c_ * raise_ch)
    return y * att[:, :, None, None]


if __name__ == "__main__":
    B, C, H, W = 2, 4, 16, 16
    key = jax.random.PRNGKey(0)
    kx, kw, kb = jax.random.split(key, 3)

    x = jax.random.normal(kx, (B, C, H, W), dtype=jnp.float32)
    # nn.Conv2d-shaped parameters: weight (C, 1, 5, 5), bias (C,)
    fan_in = KSIZE * KSIZE  # groups=C -> in_channels/groups * k*k
    bound = 1.0 / (fan_in ** 0.5)
    w_dw = jax.random.uniform(kw, (C, 1, KSIZE, KSIZE), jnp.float32, -bound, bound)
    b_dw = jax.random.uniform(kb, (C,), jnp.float32, -bound, bound)

    out = pca_forward(x, w_dw, b_dw)
    out = jax.block_until_ready(out)

    ref = pca_reference(x, w_dw, b_dw)
    assert out.shape == (B, C, H, W)
    assert jnp.allclose(out, ref, atol=1e-4, rtol=1e-4), "mismatch vs reference"

    print("KERNEL_OK")
</pallas_src>

<mosaic_0001>
module attributes {stable_mosaic.version = 11 : i64} {
  func.func @_pca_kernel(%arg0: i32, %arg1: memref<1x4x256xf32, #tpu.memory_space<vmem>>, %arg2: memref<25x4x256xf32, #tpu.memory_space<vmem>>, %arg3: memref<4x1xf32, #tpu.memory_space<vmem>>, %arg4: memref<1x4x256xf32, #tpu.memory_space<vmem>>) attributes {dimension_semantics = [#tpu.dimension_semantics<parallel>], iteration_bounds = array<i64: 2>, scalar_prefetch = 0 : i64, scratch_operands = 0 : i64, tpu.core_type = #tpu.core_type<tc>, window_params = [{transform_indices = @transform_0, window_bounds = array<i64: 1, 4, 256>}, {pipeline_mode = #tpu.pipeline_mode<synchronous>, transform_indices = @transform_1, window_bounds = array<i64: 25, 4, 256>}, {pipeline_mode = #tpu.pipeline_mode<synchronous>, transform_indices = @transform_2, window_bounds = array<i64: 4, 1>}, {transform_indices = @transform_3, window_bounds = array<i64: 1, 4, 256>}]} {
    %c0 = arith.constant 0 : index
    %c0_0 = arith.constant 0 : index
    %c0_1 = arith.constant 0 : index
    %0 = vector.load %arg1[%c0, %c0_0, %c0_1] : memref<1x4x256xf32, #tpu.memory_space<vmem>>, vector<1x4x256xf32>
    %1 = vector.shape_cast %0 : vector<1x4x256xf32> to vector<4x256xf32>
    %c0_2 = arith.constant 0 : index
    %c0_3 = arith.constant 0 : index
    %2 = vector.load %arg3[%c0_2, %c0_3] : memref<4x1xf32, #tpu.memory_space<vmem>>, vector<4x1xf32>
    %cst = arith.constant dense<0.000000e+00> : vector<4xf32>
    %3 = vector.multi_reduction <add>, %1, %cst [1] : vector<4x256xf32> to vector<4xf32>
    %4 = vector.shape_cast %3 : vector<4xf32> to vector<4x1xf32>
    %cst_4 = arith.constant 3.906250e-03 : f32
    %5 = vector.broadcast %cst_4 : f32 to vector<4x1xf32>
    %6 = arith.mulf %4, %5 : vector<4x1xf32>
    %c34_i32 = arith.constant 34 : i32
    %7 = tpu.dynamic_rotate %1 by %c34_i32 dim 1 : vector<4x256xf32>, i32 -> vector<4x256xf32>
    %c0_5 = arith.constant 0 : index
    %c0_6 = arith.constant 0 : index
    %c0_7 = arith.constant 0 : index
    %8 = vector.load %arg2[%c0_5, %c0_6, %c0_7] : memref<25x4x256xf32, #tpu.memory_space<vmem>>, vector<1x4x256xf32>
    %9 = vector.shape_cast %8 : vector<1x4x256xf32> to vector<4x256xf32>
    %10 = arith.mulf %7, %9 : vector<4x256xf32>
    %c33_i32 = arith.constant 33 : i32
    %11 = tpu.dynamic_rotate %1 by %c33_i32 dim 1 : vector<4x256xf32>, i32 -> vector<4x256xf32>
    %c1 = arith.constant 1 : index
    %c0_8 = arith.constant 0 : index
    %c0_9 = arith.constant 0 : index
    %12 = vector.load %arg2[%c1, %c0_8, %c0_9] : memref<25x4x256xf32, #tpu.memory_space<vmem>>, vector<1x4x256xf32>
    %13 = vector.shape_cast %12 : vector<1x4x256xf32> to vector<4x256xf32>
    %14 = arith.mulf %11, %13 : vector<4x256xf32>
    %15 = arith.addf %10, %14 : vector<4x256xf32>
    %c32_i32 = arith.constant 32 : i32
    %16 = tpu.dynamic_rotate %1 by %c32_i32 dim 1 : vector<4x256xf32>, i32 -> vector<4x256xf32>
    %c2 = arith.constant 2 : index
    %c0_10 = arith.constant 0 : index
    %c0_11 = arith.constant 0 : index
    %17 = vector.load %arg2[%c2, %c0_10, %c0_11] : memref<25x4x256xf32, #tpu.memory_space<vmem>>, vector<1x4x256xf32>
    %18 = vector.shape_cast %17 : vector<1x4x256xf32> to vector<4x256xf32>
    %19 = arith.mulf %16, %18 : vector<4x256xf32>
    %20 = arith.addf %15, %19 : vector<4x256xf32>
    %c31_i32 = arith.constant 31 : i32
    %21 = tpu.dynamic_rotate %1 by %c31_i32 dim 1 : vector<4x256xf32>, i32 -> vector<4x256xf32>
    %c3 = arith.constant 3 : index
    %c0_12 = arith.constant 0 : index
    %c0_13 = arith.constant 0 : index
    %22 = vector.load %arg2[%c3, %c0_12, %c0_13] : memref<25x4x256xf32, #tpu.memory_space<vmem>>, vector<1x4x256xf32>
    %23 = vector.shape_cast %22 : vector<1x4x256xf32> to vector<4x256xf32>
    %24 = arith.mulf %21, %23 : vector<4x256xf32>
    %25 = arith.addf %20, %24 : vector<4x256xf32>
    %c30_i32 = arith.constant 30 : i32
    %26 = tpu.dynamic_rotate %1 by %c30_i32 dim 1 : vector<4x256xf32>, i32 -> vector<4x256xf32>
    %c4 = arith.constant 4 : index
    %c0_14 = arith.constant 0 : index
    %c0_15 = arith.constant 0 : index
    %27 = vector.load %arg2[%c4, %c0_14, %c0_15] : memref<25x4x256xf32, #tpu.memory_space<vmem>>, vector<1x4x256xf32>
    %28 = vector.shape_cast %27 : vector<1x4x256xf32> to vector<4x256xf32>
    %29 = arith.mulf %26, %28 : vector<4x256xf32>
    %30 = arith.addf %25, %29 : vector<4x256xf32>
    %c18_i32 = arith.constant 18 : i32
    %31 = tpu.dynamic_rotate %1 by %c18_i32 dim 1 : vector<4x256xf32>, i32 -> vector<4x256xf32>
    %c5 = arith.constant 5 : index
    %c0_16 = arith.constant 0 : index
    %c0_17 = arith.constant 0 : index
    %32 = vector.load %arg2[%c5, %c0_16, %c0_17] : memref<25x4x256xf32, #tpu.memory_space<vmem>>, vector<1x4x256xf32>
    %33 = vector.shape_cast %32 : vector<1x4x256xf32> to vector<4x256xf32>
    %34 = arith.mulf %31, %33 : vector<4x256xf32>
    %c17_i32 = arith.constant 17 : i32
    %35 = tpu.dynamic_rotate %1 by %c17_i32 dim 1 : vector<4x256xf32>, i32 -> vector<4x256xf32>
    %c6 = arith.constant 6 : index
    %c0_18 = arith.constant 0 : index
    %c0_19 = arith.constant 0 : index
    %36 = vector.load %arg2[%c6, %c0_18, %c0_19] : memref<25x4x256xf32, #tpu.memory_space<vmem>>, vector<1x4x256xf32>
    %37 = vector.shape_cast %36 : vector<1x4x256xf32> to vector<4x256xf32>
    %38 = arith.mulf %35, %37 : vector<4x256xf32>
    %39 = arith.addf %34, %38 : vector<4x256xf32>
    %c16_i32 = arith.constant 16 : i32
    %40 = tpu.dynamic_rotate %1 by %c16_i32 dim 1 : vector<4x256xf32>, i32 -> vector<4x256xf32>
    %c7 = arith.constant 7 : index
    %c0_20 = arith.constant 0 : index
    %c0_21 = arith.constant 0 : index
    %41 = vector.load %arg2[%c7, %c0_20, %c0_21] : memref<25x4x256xf32, #tpu.memory_space<vmem>>, vector<1x4x256xf32>
    %42 = vector.shape_cast %41 : vector<1x4x256xf32> to vector<4x256xf32>
    %43 = arith.mulf %40, %42 : vector<4x256xf32>
    %44 = arith.addf %39, %43 : vector<4x256xf32>
    %c15_i32 = arith.constant 15 : i32
    %45 = tpu.dynamic_rotate %1 by %c15_i32 dim 1 : vector<4x256xf32>, i32 -> vector<4x256xf32>
    %c8 = arith.constant 8 : index
    %c0_22 = arith.constant 0 : index
    %c0_23 = arith.constant 0 : index
    %46 = vector.load %arg2[%c8, %c0_22, %c0_23] : memref<25x4x256xf32, #tpu.memory_space<vmem>>, vector<1x4x256xf32>
    %47 = vector.shape_cast %46 : vector<1x4x256xf32> to vector<4x256xf32>
    %48 = arith.mulf %45, %47 : vector<4x256xf32>
    %49 = arith.addf %44, %48 : vector<4x256xf32>
    %c14_i32 = arith.constant 14 : i32
    %50 = tpu.dynamic_rotate %1 by %c14_i32 dim 1 : vector<4x256xf32>, i32 -> vector<4x256xf32>
    %c9 = arith.constant 9 : index
    %c0_24 = arith.constant 0 : index
    %c0_25 = arith.constant 0 : index
    %51 = vector.load %arg2[%c9, %c0_24, %c0_25] : memref<25x4x256xf32, #tpu.memory_space<vmem>>, vector<1x4x256xf32>
    %52 = vector.shape_cast %51 : vector<1x4x256xf32> to vector<4x256xf32>
    %53 = arith.mulf %50, %52 : vector<4x256xf32>
    %54 = arith.addf %49, %53 : vector<4x256xf32>
    %c2_i32 = arith.constant 2 : i32
    %55 = tpu.dynamic_rotate %1 by %c2_i32 dim 1 : vector<4x256xf32>, i32 -> vector<4x256xf32>
    %c10 = arith.constant 10 : index
    %c0_26 = arith.constant 0 : index
    %c0_27 = arith.constant 0 : index
    %56 = vector.load %arg2[%c10, %c0_26, %c0_27] : memref<25x4x256xf32, #tpu.memory_space<vmem>>, vector<1x4x256xf32>
    %57 = vector.shape_cast %56 : vector<1x4x256xf32> to vector<4x256xf32>
    %58 = arith.mulf %55, %57 : vector<4x256xf32>
    %c1_i32 = arith.constant 1 : i32
    %59 = tpu.dynamic_rotate %1 by %c1_i32 dim 1 : vector<4x256xf32>, i32 -> vector<4x256xf32>
    %c11 = arith.constant 11 : index
    %c0_28 = arith.constant 0 : index
    %c0_29 = arith.constant 0 : index
    %60 = vector.load %arg2[%c11, %c0_28, %c0_29] : memref<25x4x256xf32, #tpu.memory_space<vmem>>, vector<1x4x256xf32>
    %61 = vector.shape_cast %60 : vector<1x4x256xf32> to vector<4x256xf32>
    %62 = arith.mulf %59, %61 : vector<4x256xf32>
    %63 = arith.addf %58, %62 : vector<4x256xf32>
    %c12 = arith.constant 12 : index
    %c0_30 = arith.constant 0 : index
    %c0_31 = arith.constant 0 : index
    %64 = vector.load %arg2[%c12, %c0_30, %c0_31] : memref<25x4x256xf32, #tpu.memory_space<vmem>>, vector<1x4x256xf32>
    %65 = vector.shape_cast %64 : vector<1x4x256xf32> to vector<4x256xf32>
    %66 = arith.mulf %1, %65 : vector<4x256xf32>
    %67 = arith.addf %63, %66 : vector<4x256xf32>
    %c255_i32 = arith.constant 255 : i32
    %68 = tpu.dynamic_rotate %1 by %c255_i32 dim 1 : vector<4x256xf32>, i32 -> vector<4x256xf32>
    %c13 = arith.constant 13 : index
    %c0_32 = arith.constant 0 : index
    %c0_33 = arith.constant 0 : index
    %69 = vector.load %arg2[%c13, %c0_32, %c0_33] : memref<25x4x256xf32, #tpu.memory_space<vmem>>, vector<1x4x256xf32>
    %70 = vector.shape_cast %69 : vector<1x4x256xf32> to vector<4x256xf32>
    %71 = arith.mulf %68, %70 : vector<4x256xf32>
    %72 = arith.addf %67, %71 : vector<4x256xf32>
    %c254_i32 = arith.constant 254 : i32
    %73 = tpu.dynamic_rotate %1 by %c254_i32 dim 1 : vector<4x256xf32>, i32 -> vector<4x256xf32>
    %c14 = arith.constant 14 : index
    %c0_34 = arith.constant 0 : index
    %c0_35 = arith.constant 0 : index
    %74 = vector.load %arg2[%c14, %c0_34, %c0_35] : memref<25x4x256xf32, #tpu.memory_space<vmem>>, vector<1x4x256xf32>
    %75 = vector.shape_cast %74 : vector<1x4x256xf32> to vector<4x256xf32>
    %76 = arith.mulf %73, %75 : vector<4x256xf32>
    %77 = arith.addf %72, %76 : vector<4x256xf32>
    %c242_i32 = arith.constant 242 : i32
    %78 = tpu.dynamic_rotate %1 by %c242_i32 dim 1 : vector<4x256xf32>, i32 -> vector<4x256xf32>
    %c15 = arith.constant 15 : index
    %c0_36 = arith.constant 0 : index
    %c0_37 = arith.constant 0 : index
    %79 = vector.load %arg2[%c15, %c0_36, %c0_37] : memref<25x4x256xf32, #tpu.memory_space<vmem>>, vector<1x4x256xf32>
    %80 = vector.shape_cast %79 : vector<1x4x256xf32> to vector<4x256xf32>
    %81 = arith.mulf %78, %80 : vector<4x256xf32>
    %c241_i32 = arith.constant 241 : i32
    %82 = tpu.dynamic_rotate %1 by %c241_i32 dim 1 : vector<4x256xf32>, i32 -> vector<4x256xf32>
    %c16 = arith.constant 16 : index
    %c0_38 = arith.constant 0 : index
    %c0_39 = arith.constant 0 : index
    %83 = vector.load %arg2[%c16, %c0_38, %c0_39] : memref<25x4x256xf32, #tpu.memory_space<vmem>>, vector<1x4x256xf32>
    %84 = vector.shape_cast %83 : vector<1x4x256xf32> to vector<4x256xf32>
    %85 = arith.mulf %82, %84 : vector<4x256xf32>
    %86 = arith.addf %81, %85 : vector<4x256xf32>
    %c240_i32 = arith.constant 240 : i32
    %87 = tpu.dynamic_rotate %1 by %c240_i32 dim 1 : vector<4x256xf32>, i32 -> vector<4x256xf32>
    %c17 = arith.constant 17 : index
    %c0_40 = arith.constant 0 : index
    %c0_41 = arith.constant 0 : index
    %88 = vector.load %arg2[%c17, %c0_40, %c0_41] : memref<25x4x256xf32, #tpu.memory_space<vmem>>, vector<1x4x256xf32>
    %89 = vector.shape_cast %88 : vector<1x4x256xf32> to vector<4x256xf32>
    %90 = arith.mulf %87, %89 : vector<4x256xf32>
    %91 = arith.addf %86, %90 : vector<4x256xf32>
    %c239_i32 = arith.constant 239 : i32
    %92 = tpu.dynamic_rotate %1 by %c239_i32 dim 1 : vector<4x256xf32>, i32 -> vector<4x256xf32>
    %c18 = arith.constant 18 : index
    %c0_42 = arith.constant 0 : index
    %c0_43 = arith.constant 0 : index
    %93 = vector.load %arg2[%c18, %c0_42, %c0_43] : memref<25x4x256xf32, #tpu.memory_space<vmem>>, vector<1x4x256xf32>
    %94 = vector.shape_cast %93 : vector<1x4x256xf32> to vector<4x256xf32>
    %95 = arith.mulf %92, %94 : vector<4x256xf32>
    %96 = arith.addf %91, %95 : vector<4x256xf32>
    %c238_i32 = arith.constant 238 : i32
    %97 = tpu.dynamic_rotate %1 by %c238_i32 dim 1 : vector<4x256xf32>, i32 -> vector<4x256xf32>
    %c19 = arith.constant 19 : index
    %c0_44 = arith.constant 0 : index
    %c0_45 = arith.constant 0 : index
    %98 = vector.load %arg2[%c19, %c0_44, %c0_45] : memref<25x4x256xf32, #tpu.memory_space<vmem>>, vector<1x4x256xf32>
    %99 = vector.shape_cast %98 : vector<1x4x256xf32> to vector<4x256xf32>
    %100 = arith.mulf %97, %99 : vector<4x256xf32>
    %101 = arith.addf %96, %100 : vector<4x256xf32>
    %c226_i32 = arith.constant 226 : i32
    %102 = tpu.dynamic_rotate %1 by %c226_i32 dim 1 : vector<4x256xf32>, i32 -> vector<4x256xf32>
    %c20 = arith.constant 20 : index
    %c0_46 = arith.constant 0 : index
    %c0_47 = arith.constant 0 : index
    %103 = vector.load %arg2[%c20, %c0_46, %c0_47] : memref<25x4x256xf32, #tpu.memory_space<vmem>>, vector<1x4x256xf32>
    %104 = vector.shape_cast %103 : vector<1x4x256xf32> to vector<4x256xf32>
    %105 = arith.mulf %102, %104 : vector<4x256xf32>
    %c225_i32 = arith.constant 225 : i32
    %106 = tpu.dynamic_rotate %1 by %c225_i32 dim 1 : vector<4x256xf32>, i32 -> vector<4x256xf32>
    %c21 = arith.constant 21 : index
    %c0_48 = arith.constant 0 : index
    %c0_49 = arith.constant 0 : index
    %107 = vector.load %arg2[%c21, %c0_48, %c0_49] : memref<25x4x256xf32, #tpu.memory_space<vmem>>, vector<1x4x256xf32>
    %108 = vector.shape_cast %107 : vector<1x4x256xf32> to vector<4x256xf32>
    %109 = arith.mulf %106, %108 : vector<4x256xf32>
    %110 = arith.addf %105, %109 : vector<4x256xf32>
    %c224_i32 = arith.constant 224 : i32
    %111 = tpu.dynamic_rotate %1 by %c224_i32 dim 1 : vector<4x256xf32>, i32 -> vector<4x256xf32>
    %c22 = arith.constant 22 : index
    %c0_50 = arith.constant 0 : index
    %c0_51 = arith.constant 0 : index
    %112 = vector.load %arg2[%c22, %c0_50, %c0_51] : memref<25x4x256xf32, #tpu.memory_space<vmem>>, vector<1x4x256xf32>
    %113 = vector.shape_cast %112 : vector<1x4x256xf32> to vector<4x256xf32>
    %114 = arith.mulf %111, %113 : vector<4x256xf32>
    %115 = arith.addf %110, %114 : vector<4x256xf32>
    %c223_i32 = arith.constant 223 : i32
    %116 = tpu.dynamic_rotate %1 by %c223_i32 dim 1 : vector<4x256xf32>, i32 -> vector<4x256xf32>
    %c23 = arith.constant 23 : index
    %c0_52 = arith.constant 0 : index
    %c0_53 = arith.constant 0 : index
    %117 = vector.load %arg2[%c23, %c0_52, %c0_53] : memref<25x4x256xf32, #tpu.memory_space<vmem>>, vector<1x4x256xf32>
    %118 = vector.shape_cast %117 : vector<1x4x256xf32> to vector<4x256xf32>
    %119 = arith.mulf %116, %118 : vector<4x256xf32>
    %120 = arith.addf %115, %119 : vector<4x256xf32>
    %c222_i32 = arith.constant 222 : i32
    %121 = tpu.dynamic_rotate %1 by %c222_i32 dim 1 : vector<4x256xf32>, i32 -> vector<4x256xf32>
    %c24 = arith.constant 24 : index
    %c0_54 = arith.constant 0 : index
    %c0_55 = arith.constant 0 : index
    %122 = vector.load %arg2[%c24, %c0_54, %c0_55] : memref<25x4x256xf32, #tpu.memory_space<vmem>>, vector<1x4x256xf32>
    %123 = vector.shape_cast %122 : vector<1x4x256xf32> to vector<4x256xf32>
    %124 = arith.mulf %121, %123 : vector<4x256xf32>
    %125 = arith.addf %120, %124 : vector<4x256xf32>
    %126 = arith.addf %30, %54 : vector<4x256xf32>
    %127 = arith.addf %77, %101 : vector<4x256xf32>
    %128 = arith.addf %126, %127 : vector<4x256xf32>
    %129 = arith.addf %128, %125 : vector<4x256xf32>
    %cst_56 = arith.constant dense<0.000000e+00> : vector<4xf32>
    %130 = vector.multi_reduction <add>, %129, %cst_56 [1] : vector<4x256xf32> to vector<4xf32>
    %131 = vector.shape_cast %130 : vector<4xf32> to vector<4x1xf32>
    %cst_57 = arith.constant 3.906250e-03 : f32
    %132 = vector.broadcast %cst_57 : f32 to vector<4x1xf32>
    %133 = arith.mulf %131, %132 : vector<4x1xf32>
    %134 = arith.addf %133, %2 : vector<4x1xf32>
    %135 = arith.subf %134, %6 : vector<4x1xf32>
    %136 = vector.shape_cast %135 : vector<4x1xf32> to vector<1x4x1xf32>
    %cst_58 = arith.constant dense<0xFF800000> : vector<1xf32>
    %137 = vector.multi_reduction <maximumf>, %136, %cst_58 [1, 2] : vector<1x4x1xf32> to vector<1xf32>
    %138 = vector.shape_cast %137 : vector<1xf32> to vector<1x1x1xf32>
    %139 = vector.extract %138[0, 0, 0] : f32 from vector<1x1x1xf32>
    %140 = vector.broadcast %139 : f32 to vector<1x1xf32>
    %141 = vector.shape_cast %140 : vector<1x1xf32> to vector<1x1xf32>
    %142 = vector.broadcast %141 : vector<1x1xf32> to vector<4x1xf32>
    %143 = arith.subf %135, %142 : vector<4x1xf32>
    %144 = math.exp %143 : vector<4x1xf32>
    %145 = vector.shape_cast %144 : vector<4x1xf32> to vector<1x4x1xf32>
    %cst_59 = arith.constant dense<0.000000e+00> : vector<1xf32>
    %146 = vector.multi_reduction <add>, %145, %cst_59 [1, 2] : vector<1x4x1xf32> to vector<1xf32>
    %147 = vector.shape_cast %146 : vector<1xf32> to vector<1x1x1xf32>
    %148 = vector.extract %147[0, 0, 0] : f32 from vector<1x1x1xf32>
    %149 = vector.broadcast %148 : f32 to vector<1x1xf32>
    %150 = vector.shape_cast %149 : vector<1x1xf32> to vector<1x1xf32>
    %151 = vector.broadcast %150 : vector<1x1xf32> to vector<4x1xf32>
    %152 = tpu.reciprocal %151 {approx = true} : vector<4x1xf32> -> vector<4x1xf32>
    %153 = arith.mulf %151, %152 : vector<4x1xf32>
    %cst_60 = arith.constant 2.000000e+00 : f32
    %154 = vector.broadcast %cst_60 : f32 to vector<4x1xf32>
    %155 = arith.subf %154, %153 : vector<4x1xf32>
    %156 = arith.mulf %152, %155 : vector<4x1xf32>
    %157 = arith.mulf %144, %156 : vector<4x1xf32>
    %158 = arith.mulf %134, %157 : vector<4x1xf32>
    %159 = arith.addf %134, %158 : vector<4x1xf32>
    %160 = arith.negf %159 : vector<4x1xf32>
    %161 = math.exp %160 : vector<4x1xf32>
    %cst_61 = arith.constant 1.000000e+00 : f32
    %162 = vector.broadcast %cst_61 : f32 to vector<4x1xf32>
    %163 = arith.addf %162, %161 : vector<4x1xf32>
    %164 = arith.divf %162, %163 : vector<4x1xf32>
    %165 = vector.broadcast %2 : vector<4x1xf32> to vector<4x256xf32>
    %166 = arith.addf %129, %165 : vector<4x256xf32>
    %167 = vector.broadcast %164 : vector<4x1xf32> to vector<4x256xf32>
    %168 = arith.mulf %166, %167 : vector<4x256xf32>
    %c0_62 = arith.constant 0 : index
    %c0_63 = arith.constant 0 : index
    %c0_64 = arith.constant 0 : index
    %169 = vector.load %arg4[%c0_62, %c0_63, %c0_64] : memref<1x4x256xf32, #tpu.memory_space<vmem>>, vector<1x4x256xf32>
    %170 = vector.shape_cast %169 : vector<1x4x256xf32> to vector<4x256xf32>
    %171 = vector.shape_cast %168 : vector<4x256xf32> to vector<1x4x256xf32>
    tpu.vector_store %arg4[%c0_62, %c0_63, %c0_64], %171 {strides = array<i32>} : memref<1x4x256xf32, #tpu.memory_space<vmem>>, vector<1x4x256xf32>,
    return
  }
  func.func @transform_0(%arg0: i32) -> (i32, i32, i32) {
    %c0_i32 = arith.constant 0 : i32
    %c0_i32_0 = arith.constant 0 : i32
    %c0_i32_1 = arith.constant 0 : i32
    return %arg0, %c0_i32, %c0_i32_0 : i32, i32, i32
  }
  func.func @transform_1(%arg0: i32) -> (i32, i32, i32) {
    %c0_i32 = arith.constant 0 : i32
    %c0_i32_0 = arith.constant 0 : i32
    %c0_i32_1 = arith.constant 0 : i32
    %c0_i32_2 = arith.constant 0 : i32
    return %c0_i32, %c0_i32_0, %c0_i32_1 : i32, i32, i32
  }
  func.func @transform_2(%arg0: i32) -> (i32, i32) {
    %c0_i32 = arith.constant 0 : i32
    %c0_i32_0 = arith.constant 0 : i32
    %c0_i32_1 = arith.constant 0 : i32
    return %c0_i32, %c0_i32_0 : i32, i32
  }
  func.func @transform_3(%arg0: i32) -> (i32, i32, i32) {
    %c0_i32 = arith.constant 0 : i32
    %c0_i32_0 = arith.constant 0 : i32
    %c0_i32_1 = arith.constant 0 : i32
    return %arg0, %c0_i32, %c0_i32_0 : i32, i32, i32
  }
}

</mosaic_0001>

<bundles_post_ra>
// kernel: tpu_custom_call.1
= control target key start
LH: loop header
LB: loop body
LE: loop exit
PB: predicated region body
PF: predicated region fallthrough
CT: control target
= control target key end

     0   :  { %8 = vsyncpa [#allocation3], 0  ;;  %s1632_s0 = inlined_call_operand.hbm [shape: f32[2,4,256], index: 0, kind: input, shape index: {}]   ;;  %s1633_s1 = inlined_call_operand.hbm [shape: f32[25,4,256], index: 1, kind: input, shape index: {}]   ;;  %s1634_s2 = inlined_call_operand.vmem [shape: f32[4,1], index: 2, kind: input, shape index: {}]   ;;  %s1635_s3 = inlined_call_operand.hbm [shape: f32[2,4,256], index: 3, kind: output, shape index: {}]  }
   0x1   :  { %10 = vsyncpa [#allocation3 + $0x1], 0 }
   0x2   :  { %11 = vsyncpa [#allocation6], 0 }
   0x3   :  { %12 = vsyncpa [#allocation4], 0 }
   0x4   :  { %14 = vsyncpa [#allocation4 + $0x1], 0  ;;  %s1082_s12 = smov 0   ;;  %s1084_s13 = smov 0  }
   0x5   :  { %s1086_s14 = smov 0   ;;  %s1088_s15 = smov 0  }
   0x6 LB: > { %s1103_s16 = sadd.s32 4294967295, %s1030_s15   ;;  %s766_s17 = sadd.s32 4294967294, %s1030_s15   ;;  %s1030_s15 = sphi %s1088_s15, %s1665_s15   ;;  %s1026_s14 = sphi %s1086_s14, %s1664_s14   ;;  %s1022_s13 = sphi %s1084_s13, %s1663_s13   ;;  %s1018_s12 = sphi %s1082_s12, %s1662_s12  }
   0x7   : > { %p40_p0 = scmp.ne.s32.totalorder %s1022_s13, %s1018_s12  ;;  %p1636_p1 = scmp.eq.s32.totalorder %s1103_s16, 0 }
   0x8   : > { %p112_p3 = scmp.eq.s32.totalorder %s766_s17, 1  ;;  %p767_p5 = scmp.ge.s32.totalorder %s1030_s15, 1 }
   0x9   : > { %p1112_p4 = por %p1636_p1, %p40_p0  ;;  %p119_p7 = scmp.lt.s32.totalorder %s1030_s15, 3 }
   0xa   : > { %p1117_p6 = por %p112_p3, %p40_p0  ;;  %s1032_s21 = smov [#allocation5]  }
   0xb   : > { %s1640_s18 = scalar_select %p1112_p4, 1, 0 }
   0xc   : > { %s1641_s19 = scalar_select %p1117_p6, 1, 0 }
   0xd   : > { %p1122_p8 = pnand %p767_p5, %p119_p7  ;;  %s131_s22 = sshll.u32 %s1032_s21, 4  ;;  %s132_s22 = int_to_ptr.vmem [resolvable:$true] %s131_s22 }
   0xe   : > { %s1136_s24 = sadd.s32 1, %s1030_s15   ;;  %s27_s25 = sadd.s32 1, %s1026_s14 }
   0xf   : > { %s1642_s20 = scalar_select %p1122_p8, 1, 0 }
  0x10   : > { %p797_p9 = pneg %p1122_p8  ;;  %s24_s26 = ssub.s32 %s1030_s15, %s1136_s24 }
  0x11   : > { %s919_s27 = scalar_lea.vmem %s132_s22, 3200  ;;  %p927_p5 = scmp.lt.s32.totalorder %s132_s22, %s132_s22 }
  0x12   : > { %p1131_p11 = pnand %p797_p9, %p1636_p1  ;;  %p920_p13 = scmp.ne.s32.totalorder %s132_s22, %s919_s27 }
  0x13   : > { %p928_p7 = scmp.lt.s32.totalorder %s919_s27, %s919_s27 }
  0x14   : > { %p910_p12 = pneg %p1131_p11 }
  0x15   : > { %p929_p10 = por %p928_p7, %p927_p5 }
  0x16   : > { %p922_p0 = pnand %p920_p13, %p910_p12 }
  0x18   : > { %p923_p3 = pneg %p922_p0 }
  0x1a   : > { %p930_p2 = pnand %p929_p10, %p923_p3 }
  0x1c   : > { %933 = shalt.err (!%p930_p2)
}
  0x1d   : > { %s1033_s28 = smov 128   ;;  %s1034_s29 = smov 8  }
  0x1e   : > { %800 = dma.hbm_to_vmem [thread:$0]  (!%p1131_p11), %s1633_s1, 3200, %s132_s22, [#allocation6], %s1033_s28, %s1033_s28, %s1034_s29  }
  0x1f   : > { %p25_p9 = scmp.eq.s32.totalorder %s24_s26, 0  ;;  %p34_p12 = scmp.ne.s32.totalorder %s1026_s14, %s1022_s13 }
  0x20   : > { %p35_p10 = scmp.eq.s32.totalorder %s1030_s15, 0  ;;  %p810_p2 = scmp.lt.s32.totalorder %s1030_s15, 2 }
  0x21   : > { %s1153_s5 = scalar_select %p25_p9, %s1026_s14, %s27_s25  }
  0x22   : > { %p36_p13 = por %p35_p10, %p34_p12  ;;  %p1644_p0 = scmp.eq.s32.totalorder %s1103_s16, 1 }
  0x23   : > { %s148_s7 = sand.u32 1, %s1026_s14   ;;  %s783_s8 = sshll.u32 %s1030_s15, 7 }
  0x24   : > { %p1157_p3 = por %p1644_p0, %p34_p12  ;;  %s770_s9 = sshll.u32 %s148_s7, 3 }
  0x25   : > { %s1166_s17 = scalar_lea.hbm %s1632_s0, %s783_s8  ;;  %s152_s21 = scalar_lea.vmem [#allocation2], %s770_s9 }
  0x26   : > { %s1645_s6 = scalar_select %p1157_p3, 1, 0 }
  0x27   : > { %s160_s22 = sshll.u32 %s152_s21, 4  ;;  %p1168_p11 = pnand %p810_p2, %p36_p13  ;;  %s161_s22 = int_to_ptr.vmem [resolvable:$true] %s160_s22 }
  0x28   : > { %s149_s25 = scalar_lea.sflag [#allocation3], %s148_s7  ;;  %s934_s26 = scalar_lea.hbm %s1166_s17, 128 }
  0x29   : > { %p935_p5 = scmp.ne.s32.totalorder %s1166_s17, %s934_s26  ;;  %p936_p7 = pneg %p1168_p11 }
  0x2a   : > { %s939_s29 = scalar_lea.hbm %s1632_s0, 256  ;;  %p940_p10 = scmp.lt.s32.totalorder %s1166_s17, %s1632_s0 }
  0x2b   : > { %p937_p9 = pnand %p936_p7, %p935_p5  ;;  %p941_p2 = scmp.lt.s32.totalorder %s939_s29, %s934_s26 }
  0x2d   : > { %p938_p12 = pneg %p937_p9  ;;  %p942_p13 = por %p941_p2, %p940_p10 }
  0x2f   : > { %p943_p0 = pnand %p942_p13, %p938_p12 }
  0x31   : > { %946 = shalt.err (!%p943_p0)
}
  0x32   : > { %s947_s8 = scalar_lea.vmem %s161_s22, 128  ;;  %s1035_s7 = smov [#allocation2]  }
  0x33   : > { %p948_p1 = scmp.ne.s32.totalorder %s161_s22, %s947_s8  ;;  %s952_s9 = sshll.u32 %s1035_s7, 4  ;;  %s953_s9 = int_to_ptr.vmem [resolvable:$false] %s952_s9 }
  0x34   : > { %s954_s10 = scalar_lea.vmem %s953_s9, 256  ;;  %p955_p5 = scmp.lt.s32.totalorder %s161_s22, %s953_s9 }
  0x35   : > { %p950_p6 = pnand %p948_p1, %p936_p7  ;;  %p956_p9 = scmp.lt.s32.totalorder %s954_s10, %s947_s8 }
  0x37   : > { %p951_p3 = pneg %p950_p6  ;;  %p957_p4 = por %p956_p9, %p955_p5 }
  0x39   : > { %p958_p8 = pnand %p957_p4, %p951_p3 }
  0x3b   : > { %961 = shalt.err (!%p958_p8)
}
  0x3c   : > { %804 = dma.hbm_to_vmem [thread:$0]  (!%p1168_p11), %s1166_s17, 128, %s161_s22, %s149_s25  }
  0x3d   : > { %p1647_p12 = scmp.ne.s32.totalorder %s1642_s20, 0 }
  0x3e   : > { %s1189_s11 = sand.u32 (!%p1647_p12), 1, %s1022_s13   ;;  %p1648_p1 = scmp.ne.s32.totalorder (!%p1647_p12), %s1640_s18, 0 }
  0x3f   : > { %169 = sbr.rel (%p1647_p12) target bundleno = 1055 (0x41f), region = 32  ;;  %s774_s21 = sshll.u32 (!%p1647_p12), %s1189_s11, 3 }
  0x40   : > { %s172_s26 = scalar_lea.sflag (!%p1647_p12), [#allocation3], %s1189_s11  ;;  %s175_s27 = scalar_lea.vmem (!%p1647_p12), [#allocation2], %s774_s21 }
  0x44   : > { %1005 = dma.done.wait (%p1648_p1), %s172_s26, 128  }
  0x45   : > { %1007 = vsyncadd (%p1648_p1), %s172_s26, 4294967168  ;;  %p1649_p4 = scmp.eq.s32.totalorder %s1103_s16, 0 }
  0x47   : > { %1009 = dma.done.wait (%p1649_p4), [#allocation6], 3200   ;;  %p1650_p6 = pmov %p1649_p4 }
  0x48   : > { %v1203_v0 = vld [vmem:[%s175_s27] sm:$0xff]  ;;  %s1036_s20 = smov 33   ;;  %s1037_s17 = smov 34   ;;  %v1041_v2 = vmov 0   ;;  %v218_v3 = vlaneseq  ;;  %vm207_vm1 = vcmask 1043456   ;;  %v237_v7 = vld [vmem:[#allocation5 + $0x8] sm:$0xff] }
  0x49   : > { %1011 = vsyncadd (%p1650_p6), [#allocation6], 4294964096  ;;  %229 = vrot.lane.b32.xlu1 %v1203_v0, %s1036_s20  ;;  %214 = vrot.lane.b32.xlu0 %v1203_v0, %s1037_s17  ;;  %v1209_v1 = vcombine.high %v1203_v0, %v1203_v0  ;;  %s1038_s18 = smov 18   ;;  %s1039_s22 = smov 17   ;;  %v223_v8 = vld [vmem:[#allocation5] sm:$0xff]  ;;  %v301_v13 = vld [vmem:[#allocation5 + $0x28] sm:$0xff]  ;;  %v239_v17 = vcombine.high %v237_v7, %v237_v7 }
  0x4a   : > { %s1040_s23 = smov 2   ;;  %873 = vset.pattern.permute.xlu1 %v1041_v2  ;;  %874 = vset.pattern.permute.xlu0 %v1041_v2  ;;  %s1042_s25 = smov 1   ;;  %v1257_v4 = vand.u32 127, %v218_v3  ;;  %v315_v14 = vld [vmem:[#allocation5 + $0x30] sm:$0xff]  ;;  %v208_v15 = vsel %vm207_vm1, %v1203_v0, 0.0  ;;  %v225_v18 = vcombine.high %v223_v8, %v223_v8  ;;  %v303_v19 = vcombine.high %v301_v13, %v301_v13  ;;  %v402_v2 = vld [vmem:[#allocation5 + $0x60] sm:$0xff] }
  0x4b   : > { %s1043_s28 = smov 114   ;;  %s1044_s29 = smov 113   ;;  %v209_v16 = vsel %vm207_vm1, %v1209_v1, 0.0  ;;  %v317_v22 = vcombine.high %v315_v14, %v315_v14  ;;  %v1297_v54 = vld [vmem:[%s1634_s2] sm:$0xf] }
  0x4c   : > { %s1045_s30 = smov 32   ;;  %s1046_s4 = smov 16   ;;  %vm233_vm0 = vcmp.lt.s32.totalorder %v1257_v4, 33  ;;  %vm297_vm2 = vcmp.lt.s32.totalorder %v1257_v4, 18  ;;  %vm220_vm3 = vcmp.lt.s32.totalorder %v1257_v4, 34  ;;  %vm311_vm4 = vcmp.lt.s32.totalorder %v1257_v4, 17 }
  0x4d   : > { %293 = vrot.lane.b32.xlu0 %v1203_v0, %s1038_s18  ;;  %231 = vrot.lane.b32.xlu1 %v1209_v1, %s1036_s20  ;;  %s1047_s8 = smov 112   ;;  %s1048_s7 = smov 31   ;;  %v210_v23 = vadd.f32 %v209_v16, %v208_v15  ;;  %vm375_vm5 = vcmp.lt.s32.totalorder %v1257_v4, 2  ;;  %v379_v3 = vld [vmem:[#allocation5 + $0x50] sm:$0xff]  ;;  %vm389_vm6 = vcmp.lt.s32.totalorder %v1257_v4, 1  ;;  %vm445_vm7 = vcmp.lt.s32.totalorder %v1257_v4, 114 }
  0x4e   : > { %s1049_s9 = smov 15   ;;  %s1050_s10 = smov 127   ;;  %v1337_v15 = vld [vmem:[#allocation5 + $0x88] sm:$0xff]  ;;  %v1341_v16 = vld [vmem:[#allocation5 + $0x40] sm:$0xff]  ;;  %vm459_vm8 = vcmp.lt.s32.totalorder %v1257_v4, 113  ;;  %vm249_vm9 = vcmp.lt.s32.totalorder %v1257_v4, 32 }
  0x4f   : > { %s1051_s26 = smov 111   ;;  %s1052_s27 = smov 98   ;;  %vm327_vm10 = vcmp.lt.s32.totalorder %v1257_v4, 16  ;;  %vm265_vm11 = vcmp.lt.s32.totalorder %v1257_v4, 31  ;;  %vm343_vm12 = vcmp.lt.s32.totalorder %v1257_v4, 15  ;;  %vm475_vm13 = vcmp.lt.s32.totalorder %v1257_v4, 112 }
  0x50   : > { %s1053_s20 = smov 97   ;;  %vm281_vm14 = vcmp.lt.s32.totalorder %v1257_v4, 30  ;;  %vm359_vm15 = vcmp.lt.s32.totalorder %v1257_v4, 14  ;;  %p1659_p3 = scmp.ne.s32.totalorder %s1645_s6, 0 }
  0x51   : > { %295 = vrot.lane.b32.xlu1 %v1209_v1, %s1038_s18  ;;  %216 = vrot.lane.b32.xlu0 %v1209_v1, %s1037_s17  ;;  %s1054_s17 = smov 30   ;;  %s1055_s18 = smov 14  }
  0x55   : > { %309 = vrot.lane.b32.xlu1 %v1209_v1, %s1039_s22  ;;  %307 = vrot.lane.b32.xlu0 %v1203_v0, %s1039_s22  ;;  %s1056_s22 = smov 126  }
  0x59   : > { %373 = vrot.lane.b32.xlu1 %v1209_v1, %s1040_s23  ;;  %371 = vrot.lane.b32.xlu0 %v1203_v0, %s1040_s23  ;;  %s1057_s23 = smov 110  }
  0x5d   : > { %387 = vrot.lane.b32.xlu1 %v1209_v1, %s1042_s25  ;;  %385 = vrot.lane.b32.xlu0 %v1203_v0, %s1042_s25  ;;  %s1058_s25 = smov 96  }
  0x61   : > { %443 = vrot.lane.b32.xlu1 %v1209_v1, %s1043_s28  ;;  %441 = vrot.lane.b32.xlu0 %v1203_v0, %s1043_s28  ;;  %s1059_s28 = smov 95  }
  0x65   : > { %457 = vrot.lane.b32.xlu1 %v1209_v1, %s1044_s29  ;;  %455 = vrot.lane.b32.xlu0 %v1203_v0, %s1044_s29  ;;  %s1060_s29 = smov 94  }
  0x69   : > { %247 = vrot.lane.b32.xlu1 %v1209_v1, %s1045_s30  ;;  %245 = vrot.lane.b32.xlu0 %v1203_v0, %s1045_s30 }
  0x6d   : > { %325 = vrot.lane.b32.xlu1 %v1209_v1, %s1046_s4  ;;  %323 = vrot.lane.b32.xlu0 %v1203_v0, %s1046_s4 }
  0x71   : > { %473 = vrot.lane.b32.xlu1 %v1209_v1, %s1047_s8  ;;  %471 = vrot.lane.b32.xlu0 %v1203_v0, %s1047_s8 }
  0x75   : > { %263 = vrot.lane.b32.xlu1 %v1209_v1, %s1048_s7  ;;  %261 = vrot.lane.b32.xlu0 %v1203_v0, %s1048_s7 }
  0x79   : > { %341 = vrot.lane.b32.xlu1 %v1209_v1, %s1049_s9  ;;  %339 = vrot.lane.b32.xlu0 %v1203_v0, %s1049_s9  ;;  %s784_s9 = sshll.u32 %s1103_s16, 7 }
  0x7d   : > { %411 = vrot.lane.b32.xlu1 %v1209_v1, %s1050_s10  ;;  %409 = vrot.lane.b32.xlu0 %v1203_v0, %s1050_s10  ;;  %s201_s10 = scalar_lea.vmem [#allocation7], %s774_s21 }
  0x81   : > { %489 = vrot.lane.b32.xlu1 %v1209_v1, %s1051_s26  ;;  %487 = vrot.lane.b32.xlu0 %v1203_v0, %s1051_s26  ;;  %s686_s26 = sshll.u32 %s201_s10, 4  ;;  %s687_s26 = int_to_ptr.vmem [resolvable:$true] %s686_s26 }
  0x85   : > { %521 = vrot.lane.b32.xlu1 %v1209_v1, %s1052_s27  ;;  %519 = vrot.lane.b32.xlu0 %v1203_v0, %s1052_s27 }
  0x89   : > { %535 = vrot.lane.b32.xlu1 %v1209_v1, %s1053_s20  ;;  %533 = vrot.lane.b32.xlu0 %v1203_v0, %s1053_s20 }
  0x8d   : > { %279 = vrot.lane.b32.xlu1 %v1209_v1, %s1054_s17  ;;  %277 = vrot.lane.b32.xlu0 %v1203_v0, %s1054_s17  ;;  %s684_s17 = scalar_lea.hbm %s1635_s3, %s784_s9 }
  0x91   : > { %357 = vrot.lane.b32.xlu1 %v1209_v1, %s1055_s18  ;;  %355 = vrot.lane.b32.xlu0 %v1203_v0, %s1055_s18  ;;  %s672_s18 = scalar_lea.sflag [#allocation4], %s1189_s11 }
  0x95   : > { %427 = vrot.lane.b32.xlu1 %v1209_v1, %s1056_s22  ;;  %425 = vrot.lane.b32.xlu0 %v1203_v0, %s1056_s22  ;;  %s962_s22 = scalar_lea.vmem %s687_s26, 128 }
  0x96   : > { %p963_p8 = scmp.ne.s32.totalorder %s687_s26, %s962_s22 }
  0x98   : > { %p964_p11 = pnand %p963_p8, %p1659_p3 }
  0x99   : > { %505 = vrot.lane.b32.xlu1 %v1209_v1, %s1057_s23  ;;  %503 = vrot.lane.b32.xlu0 %v1203_v0, %s1057_s23  ;;  %s1061_s23 = smov [#allocation7]  }
  0x9a   : > { %p965_p7 = pneg %p964_p11  ;;  %s966_s16 = sshll.u32 %s1061_s23, 4  ;;  %s967_s16 = int_to_ptr.vmem [resolvable:$false] %s966_s16 }
  0x9b   : > { %s968_s21 = scalar_lea.vmem %s967_s16, 256  ;;  %p969_p10 = scmp.lt.s32.totalorder %s687_s26, %s967_s16 }
  0x9c   : > { %p970_p2 = scmp.lt.s32.totalorder %s968_s21, %s962_s22 }
  0x9d   : > { %551 = vrot.lane.b32.xlu1 %v1209_v1, %s1058_s25  ;;  %549 = vrot.lane.b32.xlu0 %v1203_v0, %s1058_s25 }
  0x9e   : > { %p971_p13 = por %p970_p2, %p969_p10 }
  0xa0   : > { %p972_p0 = pnand %p971_p13, %p965_p7 }
  0xa1   : > { %567 = vrot.lane.b32.xlu1 %v1209_v1, %s1059_s28  ;;  %565 = vrot.lane.b32.xlu0 %v1203_v0, %s1059_s28 }
  0xa5   : > { %583 = vrot.lane.b32.xlu1 %v1209_v1, %s1060_s29  ;;  %581 = vrot.lane.b32.xlu0 %v1203_v0, %s1060_s29 }
  0xbb   : > { %v230_v5 = vpop.permute.xlu1 %229  ;;  %v215_v6 = vpop.permute.xlu0 %214 }
  0xbf   : > { %v294_v9 = vpop.permute.xlu0 %293  ;;  %v232_v10 = vpop.permute.xlu1 %231 }
  0xc0   : > { %v234_v11 = vsel %vm233_vm0, %v230_v5, %v232_v10  ;;  %v235_v12 = vsel %vm233_vm0, %v232_v10, %v230_v5  ;;  %v393_v5 = vld [vmem:[#allocation5 + $0x58] sm:$0xff]  ;;  %v1329_v10 = vld [vmem:[#allocation5 + $0x80] sm:$0xff]  ;;  %vm413_vm0 = vcmp.lt.s32.totalorder %v1257_v4, 127 }
  0xc1   : > { %v241_v28 = vmul.f32 %v237_v7, %v235_v12  ;;  %v242_v29 = vmul.f32 %v239_v17, %v234_v11  ;;  %v1323_v7 = vmul.f32 %v402_v2, %v1203_v0  ;;  %v1331_v11 = vld [vmem:[#allocation5 + $0x10] sm:$0xff]  ;;  %v1333_v12 = vld [vmem:[#allocation5 + $0x38] sm:$0xff] }
  0xc2   : > { %v1339_v0 = vld [vmem:[#allocation5 + $0x18] sm:$0xff] }
  0xc3   : > { %v296_v20 = vpop.permute.xlu1 %295  ;;  %v217_v21 = vpop.permute.xlu0 %216 }
  0xc4   : > { %v298_v24 = vsel %vm297_vm2, %v294_v9, %v296_v20  ;;  %v299_v25 = vsel %vm297_vm2, %v296_v20, %v294_v9  ;;  %v221_v26 = vsel %vm220_vm3, %v215_v6, %v217_v21  ;;  %v222_v27 = vsel %vm220_vm3, %v217_v21, %v215_v6  ;;  %v1327_v9 = vld [vmem:[#allocation5 + $0x78] sm:$0xff]  ;;  %v1350_v20 = vld [vmem:[#allocation5 + $0x68] sm:$0xff] }
  0xc5   : > { %v227_v30 = vmul.f32 %v223_v8, %v222_v27  ;;  %v228_v31 = vmul.f32 %v225_v18, %v221_v26  ;;  %v305_v38 = vmul.f32 %v301_v13, %v299_v25  ;;  %v306_v39 = vmul.f32 %v303_v19, %v298_v24  ;;  %v1358_v24 = vld [vmem:[#allocation5 + $0xa0] sm:$0xff]  ;;  %v1366_v27 = vld [vmem:[#allocation5 + $0xa8] sm:$0xff] }
  0xc6   : > { %v381_v13 = vcombine.high %v379_v3, %v379_v3  ;;  %v451_v17 = vcombine.high %v1327_v9, %v1327_v9  ;;  %v465_v18 = vcombine.high %v1329_v10, %v1329_v10  ;;  %v255_v25 = vcombine.high %v1331_v11, %v1331_v11 }
  0xc7   : > { %v1267_v32 = vadd.f32 %v241_v28, %v227_v30  ;;  %v1269_v33 = vadd.f32 %v242_v29, %v228_v31  ;;  %v310_v34 = vpop.permute.xlu1 %309  ;;  %v308_v35 = vpop.permute.xlu0 %307  ;;  %v333_v26 = vcombine.high %v1333_v12, %v1333_v12  ;;  %v1368_v28 = vld [vmem:[#allocation5 + $0x20] sm:$0xff]  ;;  %v271_v30 = vcombine.high %v1339_v0, %v1339_v0  ;;  %v1376_v31 = vld [vmem:[#allocation5 + $0x48] sm:$0xff] }
  0xc8   : > { %v312_v36 = vsel %vm311_vm4, %v308_v35, %v310_v34  ;;  %v313_v37 = vsel %vm311_vm4, %v310_v34, %v308_v35  ;;  %v1378_v34 = vld [vmem:[#allocation5 + $0x70] sm:$0xff]  ;;  %v1380_v35 = vld [vmem:[#allocation5 + $0x98] sm:$0xff]  ;;  %vm491_vm2 = vcmp.lt.s32.totalorder %v1257_v4, 111  ;;  %vm429_vm3 = vcmp.lt.s32.totalorder %v1257_v4, 126 }
  0xc9   : > { %v319_v40 = vmul.f32 %v315_v14, %v313_v37  ;;  %v320_v41 = vmul.f32 %v317_v22, %v312_v36  ;;  %211 = vadd.xlane.f32.xlu1 %v210_v23  ;;  %v395_v14 = vcombine.high %v393_v5, %v393_v5  ;;  %v1354_v22 = vld [vmem:[#allocation5 + $0x90] sm:$0xff]  ;;  %v349_v36 = vcombine.high %v1341_v16, %v1341_v16 }
  0xca   : > { %vm507_vm4 = vcmp.lt.s32.totalorder %v1257_v4, 110 }
  0xcb   : > { %v1276_v42 = vadd.f32 %v319_v40, %v305_v38  ;;  %v1278_v43 = vadd.f32 %v320_v41, %v306_v39  ;;  %v374_v44 = vpop.permute.xlu1 %373  ;;  %v372_v45 = vpop.permute.xlu0 %371  ;;  %v287_v39 = vcombine.high %v1368_v28, %v1368_v28 }
  0xcc   : > { %v1280_v46 = vsel %vm375_vm5, %v372_v45, %v374_v44  ;;  %v1282_v47 = vsel %vm375_vm5, %v374_v44, %v372_v45  ;;  %vm523_vm5 = vcmp.lt.s32.totalorder %v1257_v4, 98 }
  0xcd   : > { %v383_v38 = vmul.f32 %v379_v3, %v1282_v47  ;;  %v384_v37 = vmul.f32 %v381_v13, %v1280_v46 }
  0xcf   : > { %v1284_v48 = vpop.permute.xlu1 %387  ;;  %v386_v49 = vpop.permute.xlu0 %385 }
  0xd0   : > { %v390_v40 = vsel %vm389_vm6, %v386_v49, %v1284_v48  ;;  %v391_v41 = vsel %vm389_vm6, %v1284_v48, %v386_v49  ;;  %v513_v49 = vcombine.high %v1380_v35, %v1380_v35  ;;  %vm537_vm6 = vcmp.lt.s32.totalorder %v1257_v4, 97 }
  0xd1   : > { %v397_v48 = vmul.f32 %v393_v5, %v391_v41  ;;  %v398_v19 = vmul.f32 %v395_v14, %v390_v40 }
  0xd3   : > { %v1286_v50 = vpop.permute.xlu1 %443  ;;  %v1288_v51 = vpop.permute.xlu0 %441 }
  0xd7   : > { %v1290_v52 = vpop.permute.xlu1 %457  ;;  %v1292_v53 = vpop.permute.xlu0 %455 }
  0xd8   : > { %v460_v2 = vsel %vm459_vm8, %v1292_v53, %v1290_v52  ;;  %v461_v29 = vsel %vm459_vm8, %v1290_v52, %v1292_v53  ;;  %v446_v52 = vsel %vm445_vm7, %v1288_v51, %v1286_v50  ;;  %v447_v53 = vsel %vm445_vm7, %v1286_v50, %v1288_v51 }
  0xd9   : > { %v467_v13 = vmul.f32 %v1329_v10, %v460_v2  ;;  %v468_v14 = vmul.f32 %v465_v18, %v461_v29  ;;  %v399_v18 = vadd.f32 %v397_v48, %v383_v38  ;;  %v400_v29 = vadd.f32 %v398_v19, %v384_v37 }
  0xda   : > { %654 = vperm.xlu1 %873, %v1297_v54   ;;  %vm553_vm7 = vcmp.lt.s32.totalorder %v1257_v4, 96  ;;  %vm569_vm8 = vcmp.lt.s32.totalorder %v1257_v4, 95 }
  0xdb   : > { %v1300_v55 = vpop.permute.xlu1 %247  ;;  %v1302_v56 = vpop.permute.xlu0 %245 }
  0xdc   : > { %v250_v47 = vsel %vm249_vm9, %v1302_v56, %v1300_v55  ;;  %v251_v46 = vsel %vm249_vm9, %v1300_v55, %v1302_v56  ;;  %vm585_vm9 = vcmp.lt.s32.totalorder %v1257_v4, 94 }
  0xdf   : > { %v1304_v57 = vpop.permute.xlu1 %325  ;;  %v1306_v58 = vpop.permute.xlu0 %323 }
  0xe0   : > { %v328_v3 = vsel %vm327_vm10, %v1306_v58, %v1304_v57  ;;  %v329_v55 = vsel %vm327_vm10, %v1304_v57, %v1306_v58  ;;  %v257_v57 = vmul.f32 %v1331_v11, %v251_v46  ;;  %v258_v58 = vmul.f32 %v255_v25, %v250_v47 }
  0xe1   : > { %v335_v41 = vmul.f32 %v1333_v12, %v329_v55  ;;  %v454_v11 = vmul.f32 %v451_v17, %v447_v53  ;;  %vm613_vm10 = vcmask 3072  }
  0xe2   : > { %v259_v38 = vadd.f32 %v257_v57, %v1267_v32 }
  0xe3   : > { %v1308_v59 = vpop.permute.xlu1 %473  ;;  %v1310_v60 = vpop.permute.xlu0 %471  ;;  %v470_v37 = vadd.f32 %v468_v14, %v454_v11 }
  0xe7   : > { %v1312_v61 = vpop.permute.xlu1 %263  ;;  %v1314_v62 = vpop.permute.xlu0 %261 }
  0xe8   : > { %v266_v50 = vsel %vm265_vm11, %v1314_v62, %v1312_v61  ;;  %v267_v51 = vsel %vm265_vm11, %v1312_v61, %v1314_v62  ;;  %v336_v61 = vmul.f32 %v333_v26, %v328_v3  ;;  %v453_v62 = vmul.f32 %v1327_v9, %v446_v52 }
  0xe9   : > { %v273_v25 = vmul.f32 %v1339_v0, %v267_v51  ;;  %v274_v2 = vmul.f32 %v271_v30, %v266_v50  ;;  %v260_v9 = vadd.f32 %v258_v58, %v1269_v33  ;;  %v337_v0 = vadd.f32 %v335_v41, %v1276_v42 }
  0xea   : > { %v469_v26 = vadd.f32 %v467_v13, %v453_v62  ;;  %v338_v17 = vadd.f32 %v336_v61, %v1278_v43  ;;  %v477_v30 = vsel %vm475_vm13, %v1308_v59, %v1310_v60  ;;  %v1652_v50 = vcombine.high %v1337_v15, %v1337_v15  ;;  %v557_v61 = vld [vmem:[#allocation5 + $0xb0] sm:$0xff] }
  0xeb   : > { %v1316_v63 = vpop.permute.xlu1 %341  ;;  %v1318_v1 = vpop.permute.xlu0 %339  ;;  %v276_v32 = vadd.f32 %v274_v2, %v260_v9  ;;  %v1653_v62 = vcombine.high %v1350_v20, %v1350_v20 }
  0xec   : > { %v344_v40 = vsel %vm343_vm12, %v1318_v1, %v1316_v63  ;;  %v345_v10 = vsel %vm343_vm12, %v1316_v63, %v1318_v1  ;;  %v484_v51 = vmul.f32 %v1652_v50, %v477_v30 }
  0xed   : > { %v351_v63 = vmul.f32 %v1341_v16, %v345_v10  ;;  %v352_v1 = vmul.f32 %v349_v36, %v344_v40  ;;  %v476_v16 = vsel %vm475_vm13, %v1310_v60, %v1308_v59  ;;  %v275_v36 = vadd.f32 %v273_v25, %v259_v38 }
  0xee   : > { %v483_v14 = vmul.f32 %v1337_v15, %v476_v16  ;;  %v486_v9 = vadd.f32 %v484_v51, %v470_v37  ;;  %v1658_v51 = vcombine.high %v1358_v24, %v1358_v24 }
  0xef   : > { %v1320_v6 = vpop.permute.xlu1 %411  ;;  %v1325_v8 = vpop.permute.xlu0 %409  ;;  %v353_v52 = vadd.f32 %v351_v63, %v337_v0  ;;  %v354_v53 = vadd.f32 %v352_v1, %v338_v17  ;;  %v407_v1 = vadd.f32 %v1323_v7, %v399_v18  ;;  %v1656_v17 = vcombine.high %v1378_v34, %v1378_v34 }
  0xf0   : > { %v414_v59 = vsel %vm413_vm0, %v1325_v8, %v1320_v6  ;;  %v415_v60 = vsel %vm413_vm0, %v1320_v6, %v1325_v8  ;;  %v485_v38 = vadd.f32 %v483_v14, %v469_v26  ;;  %v589_v14 = vld [vmem:[#allocation5 + $0xc0] sm:$0xff] }
  0xf1   : > { %v421_v15 = vmul.f32 %v1350_v20, %v414_v59  ;;  %v422_v11 = vmul.f32 %v1653_v62, %v415_v60  ;;  %v1655_v20 = vcombine.high %v1323_v7, %v1323_v7 }
  0xf3   : > { %v1352_v21 = vpop.permute.xlu1 %489  ;;  %v1356_v23 = vpop.permute.xlu0 %487 }
  0xf4   : > { %v492_v57 = vsel %vm491_vm2, %v1356_v23, %v1352_v21  ;;  %v493_v6 = vsel %vm491_vm2, %v1352_v21, %v1356_v23  ;;  %v1654_v23 = vcombine.high %v1354_v22, %v1354_v22 }
  0xf5   : > { %v499_v21 = vmul.f32 %v1354_v22, %v492_v57 }
  0xf7   : > { %v1397_v44 = vpop.permute.xlu1 %521  ;;  %v1399_v45 = vpop.permute.xlu0 %519 }
  0xfb   : > { %v1449_v56 = vpop.permute.xlu1 %535  ;;  %v1451_v5 = vpop.permute.xlu0 %533 }
  0xff   : > { %v280_v47 = vpop.permute.xlu1 %279  ;;  %v278_v46 = vpop.permute.xlu0 %277 }
 0x100   : > { %v282_v19 = vsel %vm281_vm14, %v278_v46, %v280_v47  ;;  %v283_v12 = vsel %vm281_vm14, %v280_v47, %v278_v46  ;;  %v500_v47 = vmul.f32 %v1654_v23, %v493_v6 }
 0x101   : > { %v289_v33 = vmul.f32 %v1368_v28, %v283_v12  ;;  %v290_v42 = vmul.f32 %v287_v39, %v282_v19  ;;  %v1651_v39 = vcombine.high %v1376_v31, %v1376_v31  ;;  %v408_v19 = vadd.f32 %v1655_v20, %v400_v29 }
 0x102   : > { %v559_v12 = vcombine.high %v557_v61, %v557_v61  ;;  %v501_v29 = vadd.f32 %v499_v21, %v485_v38 }
 0x103   : > { %v358_v43 = vpop.permute.xlu1 %357  ;;  %v356_v48 = vpop.permute.xlu0 %355  ;;  %v291_v8 = vadd.f32 %v289_v33, %v275_v36  ;;  %v292_v58 = vadd.f32 %v290_v42, %v276_v32  ;;  %v423_v36 = vadd.f32 %v421_v15, %v407_v1  ;;  %v424_v32 = vadd.f32 %v422_v11, %v408_v19 }
 0x104   : > { %v360_v3 = vsel %vm359_vm15, %v356_v48, %v358_v43  ;;  %v361_v55 = vsel %vm359_vm15, %v358_v43, %v356_v48  ;;  %v502_v33 = vadd.f32 %v500_v47, %v486_v9  ;;  %v524_v42 = vsel %vm523_vm5, %v1399_v45, %v1397_v44 }
 0x105   : > { %v367_v28 = vmul.f32 %v1376_v31, %v361_v55  ;;  %v368_v13 = vmul.f32 %v1651_v39, %v360_v3  ;;  %v525_v43 = vsel %vm523_vm5, %v1397_v44, %v1399_v45  ;;  %v538_v48 = vsel %vm537_vm6, %v1451_v5, %v1449_v56 }
 0x106   : > { %v531_v50 = vmul.f32 %v1358_v24, %v524_v42  ;;  %v532_v57 = vmul.f32 %v1658_v51, %v525_v43  ;;  %v591_v15 = vcombine.high %v589_v14, %v589_v14 }
 0x107   : > { %v369_v31 = vadd.f32 %v367_v28, %v353_v52  ;;  %v370_v40 = vadd.f32 %v368_v13, %v354_v53  ;;  %v428_v10 = vpop.permute.xlu1 %427  ;;  %v426_v41 = vpop.permute.xlu0 %425  ;;  %v545_v28 = vmul.f32 %v1366_v27, %v538_v48 }
 0x108   : > { %v430_v25 = vsel %vm429_vm3, %v426_v41, %v428_v10  ;;  %v431_v2 = vsel %vm429_vm3, %v428_v10, %v426_v41 }
 0x109   : > { %v597_v46 = vadd.f32 %v369_v31, %v291_v8  ;;  %v598_v63 = vadd.f32 %v370_v40, %v292_v58  ;;  %v437_v0 = vmul.f32 %v1378_v34, %v430_v25  ;;  %v438_v22 = vmul.f32 %v1656_v17, %v431_v2  ;;  %v573_v34 = vld [vmem:[#allocation5 + $0xb8] sm:$0xff] }
 0x10a   : > { %v575_v45 = vcombine.high %v573_v34, %v573_v34  ;;  %v547_v62 = vadd.f32 %v545_v28, %v531_v50 }
 0x10b   : > { %v506_v16 = vpop.permute.xlu1 %505  ;;  %v504_v30 = vpop.permute.xlu0 %503  ;;  %v440_v52 = vadd.f32 %v438_v22, %v424_v32 }
 0x10c   : > { %v508_v18 = vsel %vm507_vm4, %v504_v30, %v506_v16  ;;  %v509_v7 = vsel %vm507_vm4, %v506_v16, %v504_v30 }
 0x10d   : > { %v515_v26 = vmul.f32 %v1380_v35, %v508_v18  ;;  %v516_v37 = vmul.f32 %v513_v49, %v509_v7  ;;  %v539_v35 = vsel %vm537_vm6, %v1449_v56, %v1451_v5  ;;  %v439_v49 = vadd.f32 %v437_v0, %v423_v36 }
 0x10e   : > { %v1657_v56 = vcombine.high %v1366_v27, %v1366_v27 }
 0x10f   : > { %v517_v53 = vadd.f32 %v515_v26, %v501_v29  ;;  %v518_v3 = vadd.f32 %v516_v37, %v502_v33  ;;  %v552_v55 = vpop.permute.xlu1 %551  ;;  %v550_v59 = vpop.permute.xlu0 %549 }
 0x110   : > { %v554_v60 = vsel %vm553_vm7, %v550_v59, %v552_v55  ;;  %v555_v44 = vsel %vm553_vm7, %v552_v55, %v550_v59  ;;  %v546_v5 = vmul.f32 %v1657_v56, %v539_v35 }
 0x111   : > { %v599_v39 = vadd.f32 %v517_v53, %v439_v49  ;;  %v600_v13 = vadd.f32 %v518_v3, %v440_v52  ;;  %v561_v6 = vmul.f32 %v557_v61, %v554_v60  ;;  %v562_v8 = vmul.f32 %v559_v12, %v555_v44 }
 0x112   : > { %v548_v11 = vadd.f32 %v546_v5, %v532_v57 }
 0x113   : > { %v568_v58 = vpop.permute.xlu1 %567  ;;  %v566_v31 = vpop.permute.xlu0 %565  ;;  %v601_v40 = vadd.f32 %v599_v39, %v597_v46  ;;  %v602_v10 = vadd.f32 %v600_v13, %v598_v63  ;;  %v563_v2 = vadd.f32 %v561_v6, %v547_v62 }
 0x114   : > { %v570_v41 = vsel %vm569_vm8, %v566_v31, %v568_v58  ;;  %v571_v27 = vsel %vm569_vm8, %v568_v58, %v566_v31  ;;  %v564_v61 = vadd.f32 %v562_v8, %v548_v11 }
 0x115   : > { %v577_v25 = vmul.f32 %v573_v34, %v570_v41  ;;  %v578_v24 = vmul.f32 %v575_v45, %v571_v27 }
 0x117   : > { %v584_v21 = vpop.permute.xlu1 %583  ;;  %v582_v23 = vpop.permute.xlu0 %581  ;;  %v579_v63 = vadd.f32 %v577_v25, %v563_v2  ;;  %v580_v1 = vadd.f32 %v578_v24, %v564_v61 }
 0x118   : > { %v586_v47 = vsel %vm585_vm9, %v582_v23, %v584_v21  ;;  %v587_v46 = vsel %vm585_vm9, %v584_v21, %v582_v23 }
 0x119   : > { %v593_v20 = vmul.f32 %v589_v14, %v586_v47  ;;  %v594_v19 = vmul.f32 %v591_v15, %v587_v46 }
 0x11b   : > { %v595_v12 = vadd.f32 %v593_v20, %v579_v63  ;;  %v596_v38 = vadd.f32 %v594_v19, %v580_v1 }
 0x11d   : > { %v603_v9 = vadd.f32 %v601_v40, %v595_v12  ;;  %v604_v0 = vadd.f32 %v602_v10, %v596_v38 }
 0x11f   : > { %v605_v4 = vsel %vm207_vm1, %v603_v9, 0.0  ;;  %v606_v17 = vsel %vm207_vm1, %v604_v0, 0.0 }
 0x120   : > { %v607_v22 = vadd.f32 %v606_v17, %v605_v4 }
 0x122   : > { %608 = vadd.xlane.f32.xlu0 %v607_v22 }
 0x152   : > { %v212_v16 = vpop.xlane.xlu1 %211 }
 0x153   : > { %v213_v36 = vmul.f32 0.00390625, %v212_v16 }
 0x156   : > { %v655_v40 = vpop.permute.xlu1 %654 }
 0x157   : > { %v657_v10 = vadd.f32 %v655_v40, %v603_v9  ;;  %v658_v41 = vadd.f32 %v655_v40, %v604_v0 }
 0x1ab   : > { %v609_v30 = vpop.xlane.xlu0 %608 }
 0x1ac   : > { %v610_v32 = vmul.f32 0.00390625, %v609_v30 }
 0x1ae   : > { %v611_v18 = vadd.f32 %v610_v32, %v1297_v54 }
 0x1b0   : > { %v612_v7 = vsub.f32 %v611_v18, %v213_v36 }
 0x1b2   : > { %v614_v29 = vsel %vm613_vm10, %v612_v7, -inf }
 0x1b3   : > { %615 = vmax.xlane.f32.xlu0 %v614_v29 }
 0x23c   : > { %v616_v33 = vpop.xlane.xlu0 %615 }
 0x23d   : > { %v617_v26 = vrot.slane %v616_v33, 4 }
 0x23f   : > { %v618_v37 = vmax.f32 %v616_v33, %v617_v26 }
 0x241   : > { %v619_v34 = vrot.slane %v618_v37, 2 }
 0x243   : > { %v620_v42 = vmax.f32 %v618_v37, %v619_v34 }
 0x245   : > { %v621_v43 = vrot.slane %v620_v42, 1 }
 0x247   : > { %v622_v48 = vmax.f32 %v620_v42, %v621_v43 }
 0x249   : > { %785 = vpush %v622_v48 }
 0x27a   : > { %s786_s8 = spop %785 }
 0x27b   : > { %v624_v35 = vstv %s786_s8 }
 0x27c   : > { %v625_v49 = vsub.f32 %v612_v7, %v624_v35 }
 0x27e   : > { %v626_v52 = vmul.f32 1.442695, %v625_v49 }
 0x280   : > { %900 = vpow2.f32 %v626_v52 }
 0x28d   : > { %v901_v53 = vpop.eup %900 }
 0x28e   : > { %v628_v54 = vsel %vm613_vm10, %v901_v53, 0.0 }
 0x28f   : > { %629 = vadd.xlane.f32.xlu0 %v628_v54 }
 0x318   : > { %v630_v3 = vpop.xlane.xlu0 %629 }
 0x319   : > { %v631_v55 = vrot.slane %v630_v3, 4 }
 0x31b   : > { %v632_v59 = vadd.f32 %v631_v55, %v630_v3 }
 0x31d   : > { %v633_v60 = vrot.slane %v632_v59, 2 }
 0x31f   : > { %v634_v44 = vadd.f32 %v633_v60, %v632_v59 }
 0x321   : > { %v635_v45 = vrot.slane %v634_v44, 1 }
 0x323   : > { %v636_v28 = vadd.f32 %v635_v45, %v634_v44 }
 0x325   : > { %787 = vpush %v636_v28 }
 0x356   : > { %s788_s7 = spop %787 }
 0x357   : > { %v638_v56 = vstv %s788_s7 }
 0x358   : > { %902 = vrcp.f32 %v638_v56 }
 0x365   : > { %v903_v5 = vpop.eup %902 }
 0x366   : > { %v640_v39 = vmul.f32 %v903_v5, %v638_v56 }
 0x368   : > { %v641_v13 = vsub.f32 2.0, %v640_v39 }
 0x36a   : > { %v642_v14 = vmul.f32 %v903_v5, %v641_v13 }
 0x36c   : > { %v643_v50 = vmul.f32 %v901_v53, %v642_v14 }
 0x36e   : > { %v644_v51 = vmul.f32 %v643_v50, %v611_v18 }
 0x370   : > { %v645_v57 = vadd.f32 %v644_v51, %v611_v18 }
 0x372   : > { %v777_v6 = vmul.f32 -1.442695, %v645_v57 }
 0x374   : > { %904 = vpow2.f32 %v777_v6 }
 0x381   : > { %v905_v8 = vpop.eup %904 }
 0x382   : > { %v649_v58 = vadd.f32 1.0, %v905_v8 }
 0x384   : > { %906 = vrcp.f32 %v649_v58 }
 0x391   : > { %v907_v31 = vpop.eup %906 }
 0x392   : > { %661 = vperm.xlu0 %874, %v907_v31  }
 0x40d   : > { %v662_v27 = vpop.permute.xlu0 %661 }
 0x40e   : > { %v664_v15 = vmul.f32 %v662_v27, %v657_v10  ;;  %v665_v62 = vmul.f32 %v662_v27, %v658_v41 }
 0x410   : > { %v668_v11 = vcombine.low %v664_v15, %v665_v62 }
 0x412   : > { %670 = vst [vmem:[%s201_s10] sm:$0xff] %v668_v11 }
 0x413   : > { %975 = shalt.err (!%p972_p0)
}
 0x414   : > { %s976_s25 = scalar_lea.hbm %s684_s17, 128  ;;  %s980_s29 = scalar_lea.hbm %s1635_s3, 256 }
 0x415   : > { %p977_p5 = scmp.ne.s32.totalorder %s684_s17, %s976_s25  ;;  %p981_p1 = scmp.lt.s32.totalorder %s684_s17, %s1635_s3 }
 0x416   : > { %p982_p4 = scmp.lt.s32.totalorder %s980_s29, %s976_s25 }
 0x417   : > { %p978_p9 = pnand %p977_p5, %p1659_p3 }
 0x418   : > { %p983_p6 = por %p982_p4, %p981_p1 }
 0x419   : > { %p979_p12 = pneg %p978_p9 }
 0x41b   : > { %p984_p8 = pnand %p983_p6, %p979_p12 }
 0x41d   : > { %987 = shalt.err (!%p984_p8)
}
 0x41e   : > { %795 = dma.vmem_to_hbm [thread:$0]  (%p1659_p3), %s687_s26, 128, %s684_s17, %s672_s18  }
 0x41f PF: > { %s698_s8 = sand.u32 1, %s1018_s12   ;;  %p1660_p11 = scmp.ne.s32.totalorder %s1641_s19, 0 }
 0x420   : > { %p1661_p7 = scmp.ge.s32.totalorder %s1030_s15, 2  ;;  %s699_s7 = scalar_lea.sflag [#allocation4], %s698_s8 }
 0x422   : > { %p806_p10 = pnand %p1661_p7, %p1660_p11 }
 0x424   : > { %p807_p2 = pneg %p806_p10 }
 0x426   : > { %1013 = dma.done.wait (%p807_p2), %s699_s7, 128  }
 0x427   : > { %1015 = vsyncadd (%p807_p2), %s699_s7, 4294967168  ;;  %p17_p13 = scmp.ge.s32.totalorder %s1136_s24, 4   ;;  %s1662_s12 = smov %s1022_s13 }
 0x428   : > { %s1663_s13 = smov %s1026_s14  ;;  %s1664_s14 = smov %s1153_s5 }
 0x429   : > { %s1665_s15 = smov %s1136_s24  ;;  %19 = sbr.rel (!%p17_p13) target bundleno = 6 (0x6), region = 105 }
 0x42e   :  { %704 = vsyncpa [#allocation3], 1 }
 0x42f   :  { %706 = vsyncpa [#allocation3 + $0x1], 1 }
 0x430   :  { %707 = vsyncpa [#allocation6], 1 }
 0x431   :  { %708 = vsyncpa [#allocation4], 1 }
 0x432   :  { %710 = vsyncpa [#allocation4 + $0x1], 1 }

</bundles_post_ra>
